<compile_context>
chip_gen: v5e
topology: v5e:2x2
jax: 0.10.0
libtpu: 0.0.40
codegen_flags: <defaults>
</compile_context>

<pallas_src>
import functools

import jax
import jax.numpy as jnp
import numpy as np
from jax.experimental import pallas as pl
from jax.experimental.pallas import tpu as pltpu


# --------------------------------------------------------------------------
# In-kernel core: SSIM maps for a tile of image pairs.
# --------------------------------------------------------------------------
def _ssim_maps(x, y, cmat, c1, c2, *, b_tile, H, win, cov_norm):
    """SSIM maps for b_tile image pairs.

    x, y:  (b_tile, H, W) f32
    cmat:  (W, Wo) f32 band matrix with the 1/win^2 scale folded in
    c1,c2: (b_tile, 1, 1) f32 per-image constants
    returns (b_tile, Ho, Wo) f32
    """
    W = x.shape[-1]
    Wo = cmat.shape[-1]
    Ho = H - win + 1

    # Stack the 5 quantities of all images along M and do ONE column-direction
    # box-filter matmul on the MXU (cmat stationary, systolic array full).
    q = jnp.concatenate([x, y, x * x, y * y, x * y], axis=0)        # (5b, H, W)
    t = jnp.dot(q.reshape(5 * b_tile * H, W), cmat,
                preferred_element_type=jnp.float32)                 # (5bH, Wo)
    t = t.reshape(5 * b_tile, H, Wo)

    # Row-direction win-tap sum: shifted adds along the sublane axis only
    # (no lane shifts, no MXU FLOPs).
    s = t[:, 0:Ho, :]
    for d in range(1, win):
        s = s + t[:, d:d + Ho, :]                                   # (5b, Ho, Wo)

    ux = s[0 * b_tile:1 * b_tile]
    uy = s[1 * b_tile:2 * b_tile]
    uxx = s[2 * b_tile:3 * b_tile]
    uyy = s[3 * b_tile:4 * b_tile]
    uxy = s[4 * b_tile:5 * b_tile]

    uxux = ux * ux
    uyuy = uy * uy
    uxuy = ux * uy
    vx = cov_norm * (uxx - uxux)
    vy = cov_norm * (uyy - uyuy)
    vxy = cov_norm * (uxy - uxuy)
    a1 = 2.0 * uxuy + c1
    a2 = 2.0 * vxy + c2
    b1 = uxux + uyuy + c1
    b2 = vx + vy + c2
    return (a1 * a2) / (b1 * b2)                                    # (b, Ho, Wo)


def _ssim_sum_kernel(x_ref, y_ref, cm_ref, c1_ref, c2_ref, psum_ref, *,
                     b_tile, H, win, cov_norm):
    """Reduced path: per-image partial sums only (no SSIM map writeback)."""
    s = _ssim_maps(x_ref[...], y_ref[...], cm_ref[...],
                   c1_ref[...], c2_ref[...],
                   b_tile=b_tile, H=H, win=win, cov_norm=cov_norm)
    # lane reduce, then sublane reduce -> (b_tile, 1, 1)
    psum_ref[...] = jnp.sum(jnp.sum(s, axis=2, keepdims=True),
                            axis=1, keepdims=True)


def _ssim_map_kernel(x_ref, y_ref, cm_ref, c1_ref, c2_ref, out_ref, *,
                     b_tile, H, win, cov_norm, weight):
    """Non-reduced path: store the unpadded weight*(1 - SSIM) map."""
    s = _ssim_maps(x_ref[...], y_ref[...], cm_ref[...],
                   c1_ref[...], c2_ref[...],
                   b_tile=b_tile, H=H, win=win, cov_norm=cov_norm)
    out_ref[...] = weight * (1.0 - s)


# --------------------------------------------------------------------------
# Host-side helpers.
# --------------------------------------------------------------------------
def _col_band(W, Wo, win, scale):
    """(W, Wo) band matrix: entry (j, o) = scale if o <= j < o + win."""
    j = np.arange(W)[:, None]
    o = np.arange(Wo)[None, :]
    return (((j >= o) & (j < o + win)).astype(np.float32)) * scale


def _vmem_budget_bytes():
    """Per-generation scoped-VMEM limit (~48 MiB on v7x, ~96 MiB on v5e/v6e)."""
    try:
        cap = int(pltpu.get_tpu_info().vmem_capacity_bytes)
    except Exception:
        cap = 64 * 1024 * 1024            # conservative (v7x-sized) fallback
    return min(int(cap * 3 // 4), 100 * 1024 * 1024)


def ssim_loss(X, Y, data_range=None, reduced=True, *,
              win_size=7, k1=0.01, k2=0.03, weight=1.0):
    """JAX/Pallas equivalent of SSIMLoss.forward."""
    X = jnp.asarray(X, jnp.float32)
    Y = jnp.asarray(Y, jnp.float32)
    if X.ndim == 3:
        X = X[:, None]
    if Y.ndim == 3:
        Y = Y[:, None]
    N, C, H, W = X.shape
    assert C == 1, "conv2d with a (1,1,win,win) weight requires one channel"
    assert Y.shape == X.shape
    assert H >= win_size and W >= win_size

    if data_range is None:
        data_range = jnp.max(Y)[None]              # like torch.tensor([Y.max()])
    data_range = jnp.asarray(data_range, jnp.float32).reshape(-1)
    dr = jnp.broadcast_to(data_range, (N,))
    c1 = jnp.repeat((k1 * dr) ** 2, C).reshape(N * C, 1, 1)
    c2 = jnp.repeat((k2 * dr) ** 2, C).reshape(N * C, 1, 1)

    NC = N * C
    Ho = H - win_size + 1
    Wo = W - win_size + 1
    NP = win_size * win_size
    cov_norm = NP / (NP - 1.0)

    # ---- tile sizing: full VMEM bill per image, per-generation budget ----
    vmem_limit = _vmem_budget_bytes()
    bytes_per_img = 4 * (4 * H * W          # x, y double-buffered input blocks
                         + 5 * H * W        # stacked quantities
                         + 10 * H * Wo      # column-filtered result + reshape
                         + 18 * Ho * Wo     # row sums, slices, SSIM temporaries
                         + (0 if reduced else 2 * Ho * Wo))   # output block
    budget_imgs = max(1, int(0.8 * vmem_limit) // bytes_per_img)
    b_tile = max(1, min(NC, budget_imgs))
    if NC >= 2:
        b_tile = min(b_tile, NC // 2)        # >=2 grid steps -> both v7x TCs busy
    b_tile = max(b_tile, 1)
    # TODO(synk): masked tail block (cdiv grid + pl.when) instead of divisor
    # search, so prime NC does not degrade to b_tile=1.
    while NC % b_tile:
        b_tile -= 1
    n_blocks = NC // b_tile

    Xf = X.reshape(NC, H, W)
    Yf = Y.reshape(NC, H, W)
    cmat = jnp.asarray(_col_band(W, Wo, win_size, 1.0 / NP))        # (W, Wo)

    compiler_params = pltpu.CompilerParams(
        dimension_semantics=("parallel",),           # no cross-step state
        vmem_limit_bytes=vmem_limit)

    in_specs = [
        pl.BlockSpec((b_tile, H, W), lambda b: (b, 0, 0)),    # X tile
        pl.BlockSpec((b_tile, H, W), lambda b: (b, 0, 0)),    # Y tile
        pl.BlockSpec((W, Wo), lambda b: (0, 0)),              # column band (const)
        pl.BlockSpec((b_tile, 1, 1), lambda b: (b, 0, 0)),    # C1 per image
        pl.BlockSpec((b_tile, 1, 1), lambda b: (b, 0, 0)),    # C2 per image
    ]

    if reduced:
        psums = pl.pallas_call(
            functools.partial(_ssim_sum_kernel, b_tile=b_tile, H=H,
                              win=win_size, cov_norm=cov_norm),
            out_shape=jax.ShapeDtypeStruct((NC, 1, 1), jnp.float32),
            grid=(n_blocks,),
            in_specs=in_specs,
            out_specs=pl.BlockSpec((b_tile, 1, 1), lambda b: (b, 0, 0)),
            compiler_params=compiler_params,
        )(Xf, Yf, cmat, c1, c2)
        total = jnp.sum(psums)
        return weight * (1.0 - total / float(NC * Ho * Wo))

    out = pl.pallas_call(
        functools.partial(_ssim_map_kernel, b_tile=b_tile, H=H,
                          win=win_size, cov_norm=cov_norm,
                          weight=float(weight)),
        out_shape=jax.ShapeDtypeStruct((NC, Ho, Wo), jnp.float32),
        grid=(n_blocks,),
        in_specs=in_specs,
        out_specs=pl.BlockSpec((b_tile, Ho, Wo), lambda b: (b, 0, 0)),
        compiler_params=compiler_params,
    )(Xf, Yf, cmat, c1, c2)
    return out.reshape(N, C, Ho, Wo)


# --------------------------------------------------------------------------
# Pure-JAX reference mirroring the PyTorch forward (reduced=True path).
# --------------------------------------------------------------------------
def ssim_loss_ref(X, Y, *, win_size=7, k1=0.01, k2=0.03, weight=1.0):
    X = jnp.asarray(X, jnp.float32)
    Y = jnp.asarray(Y, jnp.float32)
    dr = jnp.max(Y)
    C1 = (k1 * dr) ** 2
    C2 = (k2 * dr) ** 2
    NP = win_size ** 2
    cov_norm = NP / (NP - 1)
    w = jnp.ones((1, 1, win_size, win_size), jnp.float32) / NP

    def conv(t):
        return jax.lax.conv_general_dilated(
            t, w, (1, 1), "VALID", dimension_numbers=("NCHW", "OIHW", "NCHW"),
            precision=jax.lax.Precision.HIGHEST)

    ux, uy = conv(X), conv(Y)
    uxx, uyy, uxy = conv(X * X), conv(Y * Y), conv(X * Y)
    vx = cov_norm * (uxx - ux * ux)
    vy = cov_norm * (uyy - uy * uy)
    vxy = cov_norm * (uxy - ux * uy)
    A1, A2 = 2 * ux * uy + C1, 2 * vxy + C2
    B1, B2 = ux ** 2 + uy ** 2 + C1, vx + vy + C2
    S = (A1 * A2) / (B1 * B2)
    return weight * (1 - S.mean())


if __name__ == "__main__":
    key = jax.random.PRNGKey(0)
    kx, ky = jax.random.split(key)
    # batch=2, channels=1 (conv weight is (1,1,7,7)), spatial=16
    X = jax.random.uniform(kx, (2, 1, 16, 16), dtype=jnp.float32)
    Y = jax.random.uniform(ky, (2, 1, 16, 16), dtype=jnp.float32)

    loss = jax.block_until_ready(ssim_loss(X, Y))            # reduced=True path
    ref = jax.block_until_ready(ssim_loss_ref(X, Y))
    assert jnp.allclose(loss, ref, rtol=2e-3, atol=2e-3), (loss, ref)

    # non-reduced path: shape + consistency with the reduced loss
    s_map = jax.block_until_ready(ssim_loss(X, Y, reduced=False))
    assert s_map.shape == (2, 1, 10, 10)
    assert bool(jnp.all(jnp.isfinite(s_map)))
    assert jnp.allclose(jnp.mean(s_map), loss, rtol=2e-3, atol=2e-3)

    print("KERNEL_OK")
</pallas_src>

<mosaic_0001>
module attributes {stable_mosaic.version = 11 : i64} {
  func.func @_ssim_sum_kernel(%arg0: i32, %arg1: memref<1x16x16xf32, #tpu.memory_space<vmem>>, %arg2: memref<1x16x16xf32, #tpu.memory_space<vmem>>, %arg3: memref<16x10xf32, #tpu.memory_space<vmem>>, %arg4: memref<1x1x1xf32, #tpu.memory_space<vmem>>, %arg5: memref<1x1x1xf32, #tpu.memory_space<vmem>>, %arg6: memref<1x1x1xf32, #tpu.memory_space<vmem>>) attributes {dimension_semantics = [#tpu.dimension_semantics<parallel>], iteration_bounds = array<i64: 2>, scalar_prefetch = 0 : i64, scratch_operands = 0 : i64, tpu.core_type = #tpu.core_type<tc>, window_params = [{transform_indices = @transform_0, window_bounds = array<i64: 1, 16, 16>}, {transform_indices = @transform_1, window_bounds = array<i64: 1, 16, 16>}, {pipeline_mode = #tpu.pipeline_mode<synchronous>, transform_indices = @transform_2, window_bounds = array<i64: 16, 10>}, {transform_indices = @transform_3, window_bounds = array<i64: 1, 1, 1>}, {transform_indices = @transform_4, window_bounds = array<i64: 1, 1, 1>}, {transform_indices = @transform_5, window_bounds = array<i64: 1, 1, 1>}]} {
    %c0 = arith.constant 0 : index
    %c0_0 = arith.constant 0 : index
    %c0_1 = arith.constant 0 : index
    %0 = vector.load %arg1[%c0, %c0_0, %c0_1] : memref<1x16x16xf32, #tpu.memory_space<vmem>>, vector<1x16x16xf32>
    %c0_2 = arith.constant 0 : index
    %c0_3 = arith.constant 0 : index
    %c0_4 = arith.constant 0 : index
    %1 = vector.load %arg2[%c0_2, %c0_3, %c0_4] : memref<1x16x16xf32, #tpu.memory_space<vmem>>, vector<1x16x16xf32>
    %c0_5 = arith.constant 0 : index
    %c0_6 = arith.constant 0 : index
    %2 = vector.load %arg3[%c0_5, %c0_6] : memref<16x10xf32, #tpu.memory_space<vmem>>, vector<16x10xf32>
    %c0_7 = arith.constant 0 : index
    %c0_8 = arith.constant 0 : index
    %c0_9 = arith.constant 0 : index
    %3 = vector.load %arg4[%c0_7, %c0_8, %c0_9] : memref<1x1x1xf32, #tpu.memory_space<vmem>>, vector<1x1x1xf32>
    %c0_10 = arith.constant 0 : index
    %c0_11 = arith.constant 0 : index
    %c0_12 = arith.constant 0 : index
    %4 = vector.load %arg5[%c0_10, %c0_11, %c0_12] : memref<1x1x1xf32, #tpu.memory_space<vmem>>, vector<1x1x1xf32>
    %5 = arith.mulf %0, %0 : vector<1x16x16xf32>
    %6 = arith.mulf %1, %1 : vector<1x16x16xf32>
    %7 = arith.mulf %0, %1 : vector<1x16x16xf32>
    %8 = tpu.concatenate %0, %1, %5, %6, %7 in 0 : vector<1x16x16xf32>, vector<1x16x16xf32>, vector<1x16x16xf32>, vector<1x16x16xf32>, vector<1x16x16xf32> -> vector<5x16x16xf32>
    %9 = vector.shape_cast %8 : vector<5x16x16xf32> to vector<80x16xf32>
    %cst = arith.constant dense<0.000000e+00> : vector<80x10xf32>
    %10 = tpu.matmul %9, %2, %cst {dimension_numbers = #tpu.dot_dimension_numbers<[1], [0], [0], [1], [0, 0, 1, 1], [], []>} : vector<80x16xf32>, vector<16x10xf32>, vector<80x10xf32> -> vector<80x10xf32>
    %11 = vector.shape_cast %10 : vector<80x10xf32> to vector<5x16x10xf32>
    %12 = vector.extract_strided_slice %11 {offsets = [0, 0, 0], sizes = [5, 10, 10], strides = [1, 1, 1]} : vector<5x16x10xf32> to vector<5x10x10xf32>
    %13 = vector.extract_strided_slice %11 {offsets = [0, 1, 0], sizes = [5, 10, 10], strides = [1, 1, 1]} : vector<5x16x10xf32> to vector<5x10x10xf32>
    %14 = arith.addf %12, %13 : vector<5x10x10xf32>
    %15 = vector.extract_strided_slice %11 {offsets = [0, 2, 0], sizes = [5, 10, 10], strides = [1, 1, 1]} : vector<5x16x10xf32> to vector<5x10x10xf32>
    %16 = arith.addf %14, %15 : vector<5x10x10xf32>
    %17 = vector.extract_strided_slice %11 {offsets = [0, 3, 0], sizes = [5, 10, 10], strides = [1, 1, 1]} : vector<5x16x10xf32> to vector<5x10x10xf32>
    %18 = arith.addf %16, %17 : vector<5x10x10xf32>
    %19 = vector.extract_strided_slice %11 {offsets = [0, 4, 0], sizes = [5, 10, 10], strides = [1, 1, 1]} : vector<5x16x10xf32> to vector<5x10x10xf32>
    %20 = arith.addf %18, %19 : vector<5x10x10xf32>
    %21 = vector.extract_strided_slice %11 {offsets = [0, 5, 0], sizes = [5, 10, 10], strides = [1, 1, 1]} : vector<5x16x10xf32> to vector<5x10x10xf32>
    %22 = arith.addf %20, %21 : vector<5x10x10xf32>
    %23 = vector.extract_strided_slice %11 {offsets = [0, 6, 0], sizes = [5, 10, 10], strides = [1, 1, 1]} : vector<5x16x10xf32> to vector<5x10x10xf32>
    %24 = arith.addf %22, %23 : vector<5x10x10xf32>
    %25 = vector.extract_strided_slice %24 {offsets = [0, 0, 0], sizes = [1, 10, 10], strides = [1, 1, 1]} : vector<5x10x10xf32> to vector<1x10x10xf32>
    %26 = vector.extract_strided_slice %24 {offsets = [1, 0, 0], sizes = [1, 10, 10], strides = [1, 1, 1]} : vector<5x10x10xf32> to vector<1x10x10xf32>
    %27 = vector.extract_strided_slice %24 {offsets = [2, 0, 0], sizes = [1, 10, 10], strides = [1, 1, 1]} : vector<5x10x10xf32> to vector<1x10x10xf32>
    %28 = vector.extract_strided_slice %24 {offsets = [3, 0, 0], sizes = [1, 10, 10], strides = [1, 1, 1]} : vector<5x10x10xf32> to vector<1x10x10xf32>
    %29 = vector.extract_strided_slice %24 {offsets = [4, 0, 0], sizes = [1, 10, 10], strides = [1, 1, 1]} : vector<5x10x10xf32> to vector<1x10x10xf32>
    %30 = arith.mulf %25, %25 : vector<1x10x10xf32>
    %31 = arith.mulf %26, %26 : vector<1x10x10xf32>
    %32 = arith.mulf %25, %26 : vector<1x10x10xf32>
    %33 = arith.subf %27, %30 : vector<1x10x10xf32>
    %cst_13 = arith.constant 1.02083337 : f32
    %34 = vector.broadcast %cst_13 : f32 to vector<1x10x10xf32>
    %35 = arith.mulf %34, %33 : vector<1x10x10xf32>
    %36 = arith.subf %28, %31 : vector<1x10x10xf32>
    %cst_14 = arith.constant 1.02083337 : f32
    %37 = vector.broadcast %cst_14 : f32 to vector<1x10x10xf32>
    %38 = arith.mulf %37, %36 : vector<1x10x10xf32>
    %39 = arith.subf %29, %32 : vector<1x10x10xf32>
    %cst_15 = arith.constant 1.02083337 : f32
    %40 = vector.broadcast %cst_15 : f32 to vector<1x10x10xf32>
    %41 = arith.mulf %40, %39 : vector<1x10x10xf32>
    %cst_16 = arith.constant 2.000000e+00 : f32
    %42 = vector.broadcast %cst_16 : f32 to vector<1x10x10xf32>
    %43 = arith.mulf %42, %32 : vector<1x10x10xf32>
    %44 = vector.broadcast %3 : vector<1x1x1xf32> to vector<1x10x10xf32>
    %45 = arith.addf %43, %44 : vector<1x10x10xf32>
    %cst_17 = arith.constant 2.000000e+00 : f32
    %46 = vector.broadcast %cst_17 : f32 to vector<1x10x10xf32>
    %47 = arith.mulf %46, %41 : vector<1x10x10xf32>
    %48 = vector.broadcast %4 : vector<1x1x1xf32> to vector<1x10x10xf32>
    %49 = arith.addf %47, %48 : vector<1x10x10xf32>
    %50 = arith.addf %30, %31 : vector<1x10x10xf32>
    %51 = vector.broadcast %3 : vector<1x1x1xf32> to vector<1x10x10xf32>
    %52 = arith.addf %50, %51 : vector<1x10x10xf32>
    %53 = arith.addf %35, %38 : vector<1x10x10xf32>
    %54 = vector.broadcast %4 : vector<1x1x1xf32> to vector<1x10x10xf32>
    %55 = arith.addf %53, %54 : vector<1x10x10xf32>
    %56 = arith.mulf %45, %49 : vector<1x10x10xf32>
    %57 = arith.mulf %52, %55 : vector<1x10x10xf32>
    %58 = arith.divf %56, %57 : vector<1x10x10xf32>
    %cst_18 = arith.constant dense<0.000000e+00> : vector<1x10xf32>
    %59 = vector.multi_reduction <add>, %58, %cst_18 [2] : vector<1x10x10xf32> to vector<1x10xf32>
    %60 = vector.shape_cast %59 : vector<1x10xf32> to vector<1x10x1xf32>
    %cst_19 = arith.constant dense<0.000000e+00> : vector<1x1xf32>
    %61 = vector.multi_reduction <add>, %60, %cst_19 [1] : vector<1x10x1xf32> to vector<1x1xf32>
    %62 = vector.shape_cast %61 : vector<1x1xf32> to vector<1x1x1xf32>
    %c0_20 = arith.constant 0 : index
    %c0_21 = arith.constant 0 : index
    %c0_22 = arith.constant 0 : index
    %63 = vector.load %arg6[%c0_20, %c0_21, %c0_22] : memref<1x1x1xf32, #tpu.memory_space<vmem>>, vector<1x1x1xf32>
    tpu.vector_store %arg6[%c0_20, %c0_21, %c0_22], %62 {strides = array<i32>} : memref<1x1x1xf32, #tpu.memory_space<vmem>>, vector<1x1x1xf32>,
    return
  }
  func.func @transform_0(%arg0: i32) -> (i32, i32, i32) {
    %c0_i32 = arith.constant 0 : i32
    %c0_i32_0 = arith.constant 0 : i32
    %c0_i32_1 = arith.constant 0 : i32
    return %arg0, %c0_i32, %c0_i32_0 : i32, i32, i32
  }
  func.func @transform_1(%arg0: i32) -> (i32, i32, i32) {
    %c0_i32 = arith.constant 0 : i32
    %c0_i32_0 = arith.constant 0 : i32
    %c0_i32_1 = arith.constant 0 : i32
    return %arg0, %c0_i32, %c0_i32_0 : i32, i32, i32
  }
  func.func @transform_2(%arg0: i32) -> (i32, i32) {
    %c0_i32 = arith.constant 0 : i32
    %c0_i32_0 = arith.constant 0 : i32
    %c0_i32_1 = arith.constant 0 : i32
    return %c0_i32, %c0_i32_0 : i32, i32
  }
  func.func @transform_3(%arg0: i32) -> (i32, i32, i32) {
    %c0_i32 = arith.constant 0 : i32
    %c0_i32_0 = arith.constant 0 : i32
    %c0_i32_1 = arith.constant 0 : i32
    return %arg0, %c0_i32, %c0_i32_0 : i32, i32, i32
  }
  func.func @transform_4(%arg0: i32) -> (i32, i32, i32) {
    %c0_i32 = arith.constant 0 : i32
    %c0_i32_0 = arith.constant 0 : i32
    %c0_i32_1 = arith.constant 0 : i32
    return %arg0, %c0_i32, %c0_i32_0 : i32, i32, i32
  }
  func.func @transform_5(%arg0: i32) -> (i32, i32, i32) {
    %c0_i32 = arith.constant 0 : i32
    %c0_i32_0 = arith.constant 0 : i32
    %c0_i32_1 = arith.constant 0 : i32
    return %arg0, %c0_i32, %c0_i32_0 : i32, i32, i32
  }
}

</mosaic_0001>

<bundles_post_ra>
// kernel: tpu_custom_call.1
= control target key start
LH: loop header
LB: loop body
LE: loop exit
PB: predicated region body
PF: predicated region fallthrough
CT: control target
= control target key end

     0   :  { %s1482_s0 = inlined_call_operand.hbm [shape: f32[2,16,16], index: 0, kind: input, shape index: {}]   ;;  %s1483_s1 = inlined_call_operand.hbm [shape: f32[2,16,16], index: 1, kind: input, shape index: {}]   ;;  %s1484_s2 = inlined_call_operand.hbm [shape: f32[16,10], index: 2, kind: input, shape index: {}]   ;;  %s1485_s3 = inlined_call_operand.vmem [shape: f32[2,1,1], index: 3, kind: input, shape index: {}]   ;;  %s1486_s4 = inlined_call_operand.vmem [shape: f32[2,1,1], index: 4, kind: input, shape index: {}]   ;;  %s1487_s5 = inlined_call_operand.vmem [shape: f32[2,1,1], index: 5, kind: output, shape index: {}]  }
   0x1   :  { %1490 = sst [smem:[#allocation10_spill]] %s1482_s0 }
   0x2   :  { %10 = vsyncpa [#allocation3], 0 }
   0x3   :  { %12 = vsyncpa [#allocation3 + $0x1], 0 }
   0x4   :  { %13 = vsyncpa [#allocation5], 0 }
   0x5   :  { %15 = vsyncpa [#allocation5 + $0x1], 0  ;;  %s1121_s18 = smov 0   ;;  %s1123_s19 = smov 0  }
   0x6   :  { %s1125_s20 = smov 0   ;;  %s1127_s21 = smov 0  }
   0x7 LB: > { %s1140_s22 = sadd.s32 4294967295, %s1085_s21   ;;  %p41_p0 = scmp.ne.s32.totalorder %s1077_s19, %s1073_s18  ;;  %s1085_s21 = sphi %s1127_s21, %s1499_s21   ;;  %s1081_s20 = sphi %s1125_s20, %s1498_s20   ;;  %s1077_s19 = sphi %s1123_s19, %s1497_s19   ;;  %s1073_s18 = sphi %s1121_s18, %s1496_s18  }
   0x8   : > { %p42_p1 = scmp.eq.s32.totalorder %s1140_s22, 0  ;;  %p855_p2 = scmp.ge.s32.totalorder %s1085_s21, 1 }
   0x9   : > { %p177_p3 = scmp.lt.s32.totalorder %s1085_s21, 3  ;;  %s188_s26 = sshll.u32 %s1484_s2, 4  ;;  %s189_s26 = int_to_ptr.hbm [resolvable:$true] %s188_s26 }
   0xa   : > { %p1148_p4 = por %p42_p1, %p41_p0  ;;  %s1087_s28 = smov [#allocation6]  }
   0xb   : > { %p1155_p5 = pnand %p855_p2, %p177_p3  ;;  %s190_s29 = sshll.u32 %s1087_s28, 4  ;;  %s191_s29 = int_to_ptr.vmem [resolvable:$true] %s190_s29 }
   0xc   : > { %s1164_s30 = sadd.s32 1, %s1085_s21   ;;  %s1488_s6 = smov 128  }
   0xd   : > { %p896_p6 = pneg %p1155_p5  ;;  %s1089_s7 = smov 8  }
   0xe   : > { %s25_s8 = ssub.s32 %s1085_s21, %s1164_s30  ;;  %s28_s9 = sadd.s32 1, %s1081_s20 }
   0xf   : > { %p897_p7 = pnand %p896_p6, %p42_p1  ;;  %p26_p8 = scmp.eq.s32.totalorder %s25_s8, 0 }
  0x10   : > { %p35_p9 = scmp.ne.s32.totalorder %s1081_s20, %s1077_s19  ;;  %p36_p10 = scmp.eq.s32.totalorder %s1085_s21, 0 }
  0x11   : > { %899 = dma.hbm_to_vmem [thread:$0]  (!%p897_p7), %s189_s26, 256, %s191_s29, [#allocation5], %s1488_s6, %s1488_s6, %s1089_s7  }
  0x12   : > { %p908_p11 = scmp.lt.s32.totalorder %s1085_s21, 2  ;;  %p37_p12 = por %p36_p10, %p35_p9 }
  0x13   : > { %s1177_s10 = scalar_select %p26_p8, %s1081_s20, %s28_s9  }
  0x14   : > { %s204_s11 = sand.u32 1, %s1081_s20   ;;  %s880_s13 = sshll.u32 %s1085_s21, 4 }
  0x15   : > { %s1180_s12 = sshll.u32 %s204_s11, 4  ;;  %s1493_s0 = sld [smem:[#allocation10_spill]] }
  0x16   : > { %s208_s17 = scalar_lea.vmem [#allocation2], %s1180_s12  ;;  %p1187_p13 = pnand %p908_p11, %p37_p12 }
  0x17   : > { %s216_s18 = sshll.u32 %s208_s17, 4  ;;  %s235_s29 = scalar_lea.hbm %s1483_s1, %s880_s13  ;;  %s217_s18 = int_to_ptr.vmem [resolvable:$true] %s216_s18 }
  0x18   : > { %s236_s8 = sshll.u32 %s235_s29, 4  ;;  %s205_s9 = scalar_lea.sflag [#allocation3], %s204_s11  ;;  %s237_s8 = int_to_ptr.hbm [resolvable:$true] %s236_s8 }
  0x19   : > { %p987_p2 = pneg %p1187_p13 }
  0x1b   : > { %s213_s16 = scalar_lea.hbm %s1493_s0, %s880_s13  ;;  %s990_s17 = scalar_lea.hbm %s1493_s0, 32 }
  0x1c   : > { %s214_s24 = sshll.u32 %s213_s16, 4  ;;  %s215_s24 = int_to_ptr.hbm [resolvable:$true] %s214_s24 }
  0x1d   : > { %s983_s6 = sshra.s32 %s215_s24, 4  ;;  %s984_s6 = int_to_ptr.hbm [resolvable:$true] %s983_s6 }
  0x1e   : > { %s985_s14 = scalar_lea.hbm %s984_s6, 16  ;;  %p991_p7 = scmp.lt.s32.totalorder %s984_s6, %s1493_s0 }
  0x1f   : > { %p986_p0 = scmp.ne.s32.totalorder %s984_s6, %s985_s14  ;;  %p992_p8 = scmp.lt.s32.totalorder %s990_s17, %s985_s14 }
  0x21   : > { %p988_p3 = pnand %p987_p2, %p986_p0  ;;  %p993_p9 = por %p992_p8, %p991_p7 }
  0x23   : > { %p989_p6 = pneg %p988_p3 }
  0x25   : > { %p994_p10 = pnand %p993_p9, %p989_p6 }
  0x27   : > { %997 = shalt.err (!%p994_p10)
}
  0x28   : > { %s1495_s11 = smov 128   ;;  %s230_s13 = scalar_lea.vmem [#allocation4], %s1180_s12 }
  0x29   : > { %903 = dma.hbm_to_vmem [thread:$0]  (!%p1187_p13), %s215_s24, 256, %s217_s18, %s205_s9, %s1495_s11, %s1495_s11, %s1089_s7  }
  0x2a   : > { %s238_s29 = sshll.u32 %s230_s13, 4  ;;  %s226_s15 = sand.u32 1, %s1085_s21   ;;  %s239_s29 = int_to_ptr.vmem [resolvable:$true] %s238_s29 }
  0x2b   : > { %s227_s16 = scalar_lea.sflag [#allocation5], %s226_s15  ;;  %s1013_s6 = sshra.s32 %s237_s8, 4  ;;  %s1014_s6 = int_to_ptr.hbm [resolvable:$true] %s1013_s6 }
  0x2c   : > { %s1015_s14 = scalar_lea.hbm %s1014_s6, 16  ;;  %s1020_s28 = scalar_lea.hbm %s1483_s1, 32 }
  0x2d   : > { %p1016_p11 = scmp.ne.s32.totalorder %s1014_s6, %s1015_s14  ;;  %p1021_p3 = scmp.lt.s32.totalorder %s1014_s6, %s1483_s1 }
  0x2e   : > { %p1022_p6 = scmp.lt.s32.totalorder %s1020_s28, %s1015_s14 }
  0x2f   : > { %p1018_p12 = pnand %p1016_p11, %p987_p2 }
  0x30   : > { %p1023_p7 = por %p1022_p6, %p1021_p3 }
  0x31   : > { %p1019_p0 = pneg %p1018_p12 }
  0x33   : > { %p1024_p8 = pnand %p1023_p7, %p1019_p0 }
  0x35   : > { %1027 = shalt.err (!%p1024_p8)
}
  0x36   : > { %906 = dma.hbm_to_vmem [thread:$0]  (!%p1187_p13), %s237_s8, 256, %s239_s29, %s227_s16, %s1495_s11, %s1495_s11, %s1089_s7  }
  0x37   : > { %262 = sbr.rel (%p1155_p5) target bundleno = 407 (0x197), region = 40  ;;  %s264_s21 = sand.u32 (!%p1155_p5), 1, %s1077_s19  }
  0x38   : > { %s1229_s12 = sshll.u32 (!%p1155_p5), %s264_s21, 4  ;;  %s265_s0 = scalar_lea.sflag (!%p1155_p5), [#allocation3], %s264_s21 }
  0x39   : > { %s268_s24 = scalar_lea.vmem (!%p1155_p5), [#allocation2], %s1229_s12 }
  0x3c   : > { %1060 = dma.done.wait (%p1148_p4), %s265_s0, 256  }
  0x3d   : > { %1062 = vsyncadd (%p1148_p4), %s265_s0, 4294967040  ;;  %s274_s7 = sand.u32 1, %s1140_s22   ;;  %s278_s27 = scalar_lea.vmem [#allocation4], %s1229_s12 }
  0x3e   : > { %s275_s25 = scalar_lea.sflag [#allocation5], %s274_s7 }
  0x3f   : > { %1064 = dma.done.wait (%p1148_p4), %s275_s25, 256  }
  0x40   : > { %1066 = vsyncadd (%p1148_p4), %s275_s25, 4294967040 }
  0x41   : > { %1068 = dma.done.wait (%p42_p1), [#allocation5], 256  }
  0x42   : > { %1070 = vsyncadd (%p42_p1), [#allocation5], 4294967040  ;;  %p320_p5 = scmp.lt.s32.totalorder %s1140_s22, 1  ;;  %v1090_v0 = vmov 0   ;;  %v334_v1 = vld [vmem:[#allocation6 + $0x8] sm:$0xff]  ;;  %v333_v2 = vld [vmem:[#allocation6] sm:$0xff] }
  0x43   : > { %946 = vset.pattern.permute.xlu0 %v1090_v0  ;;  %388 = vmatpush.msra.mxu0 %v334_v1  ;;  %v332_v3 = vld [vmem:[%s278_s27 + $0x8] sm:$0xff]  ;;  %v331_v4 = vld [vmem:[%s278_s27] sm:$0xff]  ;;  %vm343_vm0 = vcmask 130048   ;;  %vm467_vm1 = vcmask 1045504   ;;  %vm431_vm2 = vcmask 1046528   ;;  %vm503_vm3 = vcmask 1044480  }
  0x44   : > { %s1501_s22 = smov (!%p320_p5, %s1140_s22), 1  ;;  %882 = vmatpush.msra.mxu1 %v334_v1  ;;  %883 = vmatpush.msra.mxu2 %v334_v1  ;;  %v329_v5 = vld [vmem:[%s268_s24] sm:$0xff]  ;;  %v339_v6 = vmul.f32 %v331_v4, %v331_v4  ;;  %v340_v7 = vmul.f32 %v332_v3, %v332_v3  ;;  %v330_v10 = vld [vmem:[%s268_s24 + $0x8] sm:$0xff]  ;;  %vm539_vm4 = vcmask 1043456   ;;  %vm575_vm5 = vcmask 1042432  }
  0x45   : > { %s322_s9 = scalar_lea.vmem %s1485_s3, %s1501_s22  ;;  %s325_s29 = scalar_lea.vmem %s1486_s4, %s1501_s22  ;;  %884 = vmatpush.msra.mxu3 %v334_v1  ;;  %389 = vmatpush.msra.mxu0 %v333_v2  ;;  %v337_v9 = vmul.f32 %v329_v5, %v329_v5  ;;  %v341_v11 = vmul.f32 %v331_v4, %v329_v5  ;;  %v338_v13 = vmul.f32 %v330_v10, %v330_v10  ;;  %vm611_vm6 = vcmask 1041408  }
  0x46   : > { %885 = vmatpush.msra.mxu1 %v333_v2  ;;  %v947_v8 = vld [vmem:[%s322_s9] ss:$0 sm:$0xff]  ;;  %886 = vmatpush.msra.mxu2 %v333_v2  ;;  %v342_v14 = vmul.f32 %v332_v3, %v330_v10  ;;  %vm731_vm13 = vcmask 74752   ;;  %s328_s6 = scalar_lea.vmem %s1487_s5, %s1501_s22 }
  0x47   : > { %887 = vmatpush.msra.mxu3 %v333_v2  ;;  %868 = vmatmul.msk.f32.vlgmr.msra.gmra.mxu0 %vm343_vm0, %v329_v5  ;;  %v948_v12 = vld [vmem:[%s325_s29] ss:$0 sm:$0xff] }
  0x48   : > { %871 = vmatmul.msk.f32.vlgmr.msra.gmra.mxu1 %vm343_vm0, %v332_v3  ;;  %874 = vmatmul.msk.f32.vlgmr.msra.gmra.mxu2 %vm343_vm0, %v339_v6 }
  0x49   : > { %875 = vmatmul.msk.f32.vlgmr.msra.gmra.mxu3 %vm343_vm0, %v340_v7  ;;  %670 = vperm.xlu0 %946, %v947_v8  }
  0x4f   : > { %869 = vmatmul.msk.f32.gmra.mxu0 %vm343_vm0, %v330_v10 }
  0x50   : > { %872 = vmatmul.msk.f32.gmra.mxu1 %vm343_vm0, %v337_v9 }
  0x51   : > { %876 = vmatmul.msk.f32.gmra.mxu3 %vm343_vm0, %v341_v11  ;;  %680 = vperm.xlu0 %946, %v948_v12  }
  0x57   : > { %870 = vmatmul.msk.f32.gmra.mxu0 %vm343_vm0, %v331_v4 }
  0x58   : > { %873 = vmatmul.msk.f32.gmra.mxu1 %vm343_vm0, %v338_v13 }
  0x59   : > { %877 = vmatmul.msk.f32.gmra.mxu3 %vm343_vm0, %v342_v14  ;;  %vm727_vm0 = vcmask 80896  }
  0xc4   : > { %v1272_v15 = vpop.f32.mrf.mxu0 }
  0xc5   : > { %v1274_v16 = vpop.f32.mrf.mxu1  ;;  %v432_v23 = vrot.slane %v1272_v15, 1  ;;  %v468_v25 = vrot.slane %v1272_v15, 2  ;;  %v504_v26 = vrot.slane %v1272_v15, 3  ;;  %v540_v30 = vrot.slane %v1272_v15, 4 }
  0xc6   : > { %v436_v17 = vrot.slane %v1274_v16, 1  ;;  %v472_v19 = vrot.slane %v1274_v16, 2  ;;  %v576_v31 = vrot.slane %v1272_v15, 5  ;;  %v612_v32 = vrot.slane %v1272_v15, 6 }
  0xc7   : > { %v508_v33 = vrot.slane %v1274_v16, 3  ;;  %v544_v34 = vrot.slane %v1274_v16, 4  ;;  %v580_v35 = vrot.slane %v1274_v16, 5  ;;  %v616_v37 = vrot.slane %v1274_v16, 6 }
  0xc8   : > { %v460_v18 = vadd.f32 %v436_v17, %v1274_v16 }
  0xca   : > { %v496_v24 = vadd.f32 %v472_v19, %v460_v18 }
  0xcb   : > { %v1288_v27 = vpop.f32.mrf.mxu2 }
  0xcc   : > { %v1279_v20 = vpop.f32.mrf.mxu3  ;;  %v1281_v21 = vpop.f32.mrf.mxu0  ;;  %v532_v38 = vadd.f32 %v508_v33, %v496_v24  ;;  %v441_v39 = vrot.slane %v1288_v27, 1  ;;  %v477_v40 = vrot.slane %v1288_v27, 2  ;;  %v513_v42 = vrot.slane %v1288_v27, 3 }
  0xcd   : > { %v1283_v22 = vpop.f32.mrf.mxu1  ;;  %v442_v28 = vrot.slane %v1279_v20, 1  ;;  %v433_v29 = vrot.slane %v1281_v21, 1  ;;  %v469_v41 = vrot.slane %v1281_v21, 2  ;;  %v549_v43 = vrot.slane %v1288_v27, 4 }
  0xce   : > { %v478_v45 = vrot.slane %v1279_v20, 2  ;;  %v585_v46 = vrot.slane %v1288_v27, 5  ;;  %v621_v47 = vrot.slane %v1288_v27, 6  ;;  %v514_v51 = vrot.slane %v1279_v20, 3 }
  0xcf   : > { %v458_v36 = vadd.f32 %v433_v29, %v1281_v21  ;;  %v464_v44 = vadd.f32 %v442_v28, %v1279_v20  ;;  %v434_v50 = vsel %vm431_vm2, %v432_v23, %v433_v29  ;;  %v550_v52 = vrot.slane %v1279_v20, 4 }
  0xd0   : > { %v505_v53 = vrot.slane %v1281_v21, 3  ;;  %v541_v54 = vrot.slane %v1281_v21, 4  ;;  %v577_v57 = vrot.slane %v1281_v21, 5  ;;  %v438_v58 = vrot.slane %v1283_v22, 1 }
  0xd1   : > { %v494_v48 = vadd.f32 %v469_v41, %v458_v36  ;;  %v1328_v61 = vadd.f32 %v478_v45, %v464_v44  ;;  %v470_v62 = vsel %vm467_vm1, %v468_v25, %v469_v41  ;;  %v474_v63 = vrot.slane %v1283_v22, 2 }
  0xd2   : > { %v457_v0 = vadd.f32 %v434_v50, %v1272_v15  ;;  %v510_v5 = vrot.slane %v1283_v22, 3  ;;  %v546_v6 = vrot.slane %v1283_v22, 4  ;;  %v582_v7 = vrot.slane %v1283_v22, 5 }
  0xd3   : > { %v530_v1 = vadd.f32 %v505_v53, %v494_v48  ;;  %v506_v11 = vsel %vm503_vm3, %v504_v26, %v505_v53  ;;  %v542_v12 = vsel %vm539_vm4, %v540_v30, %v541_v54  ;;  %v568_v18 = vadd.f32 %v544_v34, %v532_v38 }
  0xd4   : > { %v1311_v49 = vpop.f32.mrf.mxu3  ;;  %v1318_v55 = vpop.f32.mrf.mxu0  ;;  %v578_v41 = vsel %vm575_vm5, %v576_v31, %v577_v57 }
  0xd5   : > { %v1320_v56 = vpop.f32.mrf.mxu1  ;;  %v435_v59 = vrot.slane %v1318_v55, 1  ;;  %v471_v60 = vrot.slane %v1318_v55, 2  ;;  %v507_v3 = vrot.slane %v1318_v55, 3  ;;  %v543_v14 = vrot.slane %v1318_v55, 4 }
  0xd6   : > { %v439_v4 = vrot.slane %v1320_v56, 1  ;;  %v566_v25 = vadd.f32 %v541_v54, %v530_v1  ;;  %v444_v26 = vrot.slane %v1311_v49, 1  ;;  %v480_v44 = vrot.slane %v1311_v49, 2 }
  0xd7   : > { %v437_v2 = vsel %vm431_vm2, %v435_v59, %v436_v17  ;;  %v473_v9 = vsel %vm467_vm1, %v471_v60, %v472_v19  ;;  %v475_v17 = vrot.slane %v1320_v56, 2  ;;  %v509_v23 = vsel %vm503_vm3, %v507_v3, %v508_v33 }
  0xd8   : > { %v459_v8 = vadd.f32 %v437_v2, %v1318_v55  ;;  %v462_v10 = vadd.f32 %v439_v4, %v1320_v56  ;;  %v440_v24 = vsel %vm431_vm2, %v438_v58, %v439_v4  ;;  %v493_v19 = vadd.f32 %v470_v62, %v457_v0 }
  0xd9   : > { %v516_v48 = vrot.slane %v1311_v49, 3  ;;  %v552_v38 = vrot.slane %v1311_v49, 4  ;;  %v511_v33 = vrot.slane %v1320_v56, 3  ;;  %v461_v50 = vadd.f32 %v440_v24, %v1283_v22 }
  0xda   : > { %v495_v13 = vadd.f32 %v473_v9, %v459_v8  ;;  %v498_v36 = vadd.f32 %v475_v17, %v462_v10  ;;  %v529_v53 = vadd.f32 %v506_v11, %v493_v19  ;;  %v604_v54 = vadd.f32 %v580_v35, %v568_v18 }
  0xdb   : > { %v545_v31 = vsel %vm539_vm4, %v543_v14, %v544_v34  ;;  %v579_v59 = vrot.slane %v1318_v55, 5  ;;  %v615_v60 = vrot.slane %v1318_v55, 6  ;;  %v602_v62 = vadd.f32 %v577_v57, %v566_v25 }
  0xdc   : > { %v1350_v29 = vpop.f32.mrf.mxu3  ;;  %v531_v30 = vadd.f32 %v509_v23, %v495_v13  ;;  %v476_v0 = vsel %vm467_vm1, %v474_v63, %v475_v17  ;;  %v534_v1 = vadd.f32 %v511_v33, %v498_v36  ;;  %v547_v2 = vrot.slane %v1320_v56, 4 }
  0xdd   : > { %v445_v58 = vrot.slane %v1350_v29, 1  ;;  %v512_v4 = vsel %vm503_vm3, %v510_v5, %v511_v33  ;;  %v613_v8 = vrot.slane %v1281_v21, 6  ;;  %v481_v10 = vrot.slane %v1350_v29, 2 }
  0xde   : > { %v567_v3 = vadd.f32 %v545_v31, %v531_v30  ;;  %v497_v34 = vadd.f32 %v476_v0, %v461_v50  ;;  %v583_v11 = vrot.slane %v1320_v56, 5  ;;  %v565_v13 = vadd.f32 %v542_v12, %v529_v53  ;;  %v1435_v31 = vpop.permute.xlu0 %670 }
  0xdf   : > { %v466_v9 = vadd.f32 %v445_v58, %v1350_v29  ;;  %v1376_v55 = vadd.f32 %v616_v37, %v604_v54  ;;  %v619_v57 = vrot.slane %v1320_v56, 6  ;;  %v581_v63 = vsel %vm575_vm5, %v579_v59, %v580_v35 }
  0xe0   : > { %v617_v21 = vsel %vm611_vm6, %v615_v60, %v616_v37  ;;  %v1385_v5 = vadd.f32 %v613_v8, %v602_v62  ;;  %v570_v14 = vadd.f32 %v547_v2, %v534_v1  ;;  %v603_v17 = vadd.f32 %v581_v63, %v567_v3 }
  0xe1   : > { %v446_v12 = vsel %vm431_vm2, %v444_v26, %v445_v58  ;;  %v443_v56 = vsel %vm431_vm2, %v441_v39, %v442_v28  ;;  %v614_v35 = vsel %vm611_vm6, %v612_v32, %v613_v8  ;;  %v502_v18 = vadd.f32 %v481_v10, %v466_v9 }
  0xe2   : > { %v517_v16 = vrot.slane %v1350_v29, 3  ;;  %v479_v37 = vsel %vm467_vm1, %v477_v40, %v478_v45  ;;  %v601_v23 = vadd.f32 %v578_v41, %v565_v13  ;;  %v650_v24 = vmul.f32 %v1376_v55, %v1376_v55 }
  0xe3   : > { %v463_v19 = vadd.f32 %v443_v56, %v1288_v27  ;;  %v533_v28 = vadd.f32 %v512_v4, %v497_v34  ;;  %v648_v15 = vmul.f32 %v1385_v5, %v1385_v5  ;;  %v465_v32 = vadd.f32 %v446_v12, %v1311_v49 }
  0xe4   : > { %v515_v39 = vsel %vm503_vm3, %v513_v42, %v514_v51  ;;  %v536_v40 = vadd.f32 %v514_v51, %v1328_v61  ;;  %v1416_v45 = vadd.f32 %v617_v21, %v603_v17  ;;  %v482_v25 = vsel %vm467_vm1, %v480_v44, %v481_v10 }
  0xe5   : > { %v499_v26 = vadd.f32 %v479_v37, %v463_v19  ;;  %v548_v30 = vsel %vm539_vm4, %v546_v6, %v547_v2  ;;  %v538_v36 = vadd.f32 %v517_v16, %v502_v18  ;;  %v551_v42 = vsel %vm539_vm4, %v549_v43, %v550_v52 }
  0xe6   : > { %v569_v41 = vadd.f32 %v548_v30, %v533_v28  ;;  %v572_v51 = vadd.f32 %v550_v52, %v536_v40  ;;  %v553_v61 = vrot.slane %v1350_v29, 4  ;;  %v589_v44 = vrot.slane %v1350_v29, 5 }
  0xe7   : > { %v535_v33 = vadd.f32 %v515_v39, %v499_v26  ;;  %v584_v6 = vsel %vm575_vm5, %v582_v7, %v583_v11  ;;  %v637_v50 = vadd.f32 %v614_v35, %v601_v23  ;;  %v586_v53 = vrot.slane %v1279_v20, 5 }
  0xe8   : > { %v605_v54 = vadd.f32 %v584_v6, %v569_v41  ;;  %v606_v58 = vadd.f32 %v583_v11, %v570_v14  ;;  %v501_v43 = vadd.f32 %v482_v25, %v465_v32  ;;  %v518_v59 = vsel %vm503_vm3, %v516_v48, %v517_v16 }
  0xe9   : > { %v571_v52 = vadd.f32 %v551_v42, %v535_v33  ;;  %v618_v60 = vrot.slane %v1283_v22, 6  ;;  %v574_v62 = vadd.f32 %v553_v61, %v538_v36  ;;  %v587_v0 = vsel %vm575_vm5, %v585_v46, %v586_v53 }
  0xea   : > { %v608_v1 = vadd.f32 %v586_v53, %v572_v51  ;;  %v622_v7 = vrot.slane %v1279_v20, 6  ;;  %v649_v2 = vmul.f32 %v1416_v45, %v1416_v45  ;;  %v642_v8 = vadd.f32 %v619_v57, %v606_v58 }
  0xeb   : > { %v607_v3 = vadd.f32 %v587_v0, %v571_v52  ;;  %v620_v4 = vsel %vm611_vm6, %v618_v60, %v619_v57  ;;  %v647_v9 = vmul.f32 %v637_v50, %v637_v50  ;;  %v537_v34 = vadd.f32 %v518_v59, %v501_v43 }
  0xec   : > { %v623_v22 = vsel %vm611_vm6, %v621_v47, %v622_v7  ;;  %v641_v48 = vadd.f32 %v620_v4, %v605_v54  ;;  %v644_v10 = vadd.f32 %v622_v7, %v608_v1  ;;  %v654_v46 = vsub.f32 %v642_v8, %v648_v15 }
  0xed   : > { %v643_v11 = vadd.f32 %v623_v22, %v607_v3  ;;  %v610_v13 = vadd.f32 %v589_v44, %v574_v62  ;;  %v686_v21 = vadd.f32 %v650_v24, %v648_v15  ;;  %v588_v12 = vrot.slane %v1311_v49, 5 }
  0xee   : > { %v653_v63 = vsub.f32 %v641_v48, %v647_v9  ;;  %v658_v20 = vsub.f32 %v644_v10, %v650_v24  ;;  %v656_v14 = vmul.f32 1.0208334, %v654_v46  ;;  %v554_v57 = vsel %vm539_vm4, %v552_v38, %v553_v61  ;;  %v681_v24 = vpop.permute.xlu0 %680 }
  0xef   : > { %v657_v17 = vsub.f32 %v643_v11, %v649_v2  ;;  %v625_v27 = vrot.slane %v1350_v29, 6  ;;  %v685_v56 = vadd.f32 %v649_v2, %v647_v9  ;;  %v573_v35 = vadd.f32 %v554_v57, %v537_v34 }
  0xf0   : > { %v660_v47 = vmul.f32 1.0208334, %v658_v20  ;;  %v655_v18 = vmul.f32 1.0208334, %v653_v63  ;;  %v688_v19 = vadd.f32 %v686_v21, %v1435_v31  ;;  %v590_v15 = vsel %vm575_vm5, %v588_v12, %v589_v44 }
  0xf1   : > { %v659_v16 = vmul.f32 1.0208334, %v657_v17  ;;  %v646_v37 = vadd.f32 %v625_v27, %v610_v13  ;;  %v624_v32 = vrot.slane %v1311_v49, 6  ;;  %v652_v38 = vmul.f32 %v1376_v55, %v1385_v5 }
  0xf2   : > { %v690_v23 = vadd.f32 %v660_v47, %v656_v14  ;;  %v687_v29 = vadd.f32 %v685_v56, %v1435_v31  ;;  %v609_v40 = vadd.f32 %v590_v15, %v573_v35  ;;  %v651_v61 = vmul.f32 %v1416_v45, %v637_v50 }
  0xf3   : > { %v689_v28 = vadd.f32 %v659_v16, %v655_v18  ;;  %v662_v26 = vsub.f32 %v646_v37, %v652_v38  ;;  %v626_v42 = vsel %vm611_vm6, %v624_v32, %v625_v27  ;;  %v666_v6 = vmul.f32 2.0, %v652_v38 }
  0xf4   : > { %v692_v39 = vadd.f32 %v690_v23, %v681_v24  ;;  %v645_v41 = vadd.f32 %v626_v42, %v609_v40  ;;  %v665_v0 = vmul.f32 2.0, %v651_v61  ;;  %vm743_vm1 = vcmask 0  }
  0xf5   : > { %v691_v25 = vadd.f32 %v689_v28, %v681_v24  ;;  %v664_v51 = vmul.f32 1.0208334, %v662_v26  ;;  %v674_v1 = vadd.f32 %v1435_v31, %v666_v6 }
  0xf6   : > { %v696_v30 = vmul.f32 %v692_v39, %v688_v19  ;;  %v661_v49 = vsub.f32 %v645_v41, %v651_v61  ;;  %v673_v13 = vadd.f32 %v1435_v31, %v665_v0 }
  0xf7   : > { %v695_v36 = vmul.f32 %v691_v25, %v687_v29  ;;  %v676_v33 = vmul.f32 2.0, %v664_v51 }
  0xf8   : > { %949 = vrcp.f32 %v696_v30  ;;  %v663_v54 = vmul.f32 1.0208334, %v661_v49  ;;  %v723_v59 = vand.u32 2147483648, %v696_v30  ;;  %v721_v62 = vand.u32 2147483647, %v696_v30 }
  0xf9   : > { %951 = vrcp.f32 %v695_v36  ;;  %v684_v43 = vadd.f32 %v681_v24, %v676_v33  ;;  %vm717_vm8 = vweird.f32 %v696_v30  ;;  %v708_v8 = vand.u32 2147483648, %v695_v36 }
  0xfa   : > { %v675_v45 = vmul.f32 2.0, %v663_v54  ;;  %v724_v3 = vor.u32 1.1754944e-38, %v723_v59  ;;  %vm722_vm11 = vcmp.eq.f32.partialorder %v721_v62, 8.507059e+37  ;;  %vm702_vm12 = vweird.f32 %v695_v36 }
  0xfb   : > { %v694_v2 = vmul.f32 %v684_v43, %v674_v1  ;;  %v706_v22 = vand.u32 2147483647, %v695_v36  ;;  %v709_v46 = vor.u32 1.1754944e-38, %v708_v8 }
  0xfc   : > { %v683_v10 = vadd.f32 %v681_v24, %v675_v45 }
  0xfd   : > { %vm707_vm15 = vcmp.eq.f32.partialorder %v706_v22, 8.507059e+37 }
  0xfe   : > { %v950_v44 = vpop.eup %949  ;;  %v693_v21 = vmul.f32 %v683_v10, %v673_v13 }
  0xff   : > { %v952_v55 = vpop.eup %951  ;;  %v713_v5 = vmul.f32 %v950_v44, %v696_v30  ;;  %vm718_vm7 = vweird.f32 %v950_v44 }
 0x100   : > { %v698_v53 = vmul.f32 %v952_v55, %v695_v36  ;;  %vm703_vm9 = vweird.f32 %v952_v55  ;;  %vm719_vm10 = vmor %vm717_vm8, %vm718_vm7 }
 0x101   : > { %v714_v58 = vsub.f32 1.0, %v713_v5  ;;  %vm704_vm14 = vmor %vm702_vm12, %vm703_vm9 }
 0x102   : > { %v699_v52 = vsub.f32 1.0, %v698_v53 }
 0x103   : > { %v715_v60 = vmul.f32 %v950_v44, %v714_v58 }
 0x104   : > { %v700_v7 = vmul.f32 %v952_v55, %v699_v52 }
 0x105   : > { %v716_v50 = vadd.f32 %v950_v44, %v715_v60 }
 0x106   : > { %v701_v4 = vadd.f32 %v952_v55, %v700_v7 }
 0x107   : > { %v720_v9 = vsel %vm719_vm10, %v950_v44, %v716_v50 }
 0x108   : > { %v725_v48 = vsel %vm722_vm11, %v724_v3, %v720_v9  ;;  %v705_v11 = vsel %vm704_vm14, %v952_v55, %v701_v4 }
 0x109   : > { %v726_v34 = vmul.f32 %v725_v48, %v694_v2  ;;  %v710_v20 = vsel %vm707_vm15, %v709_v46, %v705_v11 }
 0x10a   : > { %v711_v14 = vmul.f32 %v710_v20, %v693_v21 }
 0x10b   : > { %v732_v63 = vsel %vm731_vm13, %v726_v34, 0.0 }
 0x10c   : > { %733 = vadd.xlane.f32.xlu1 %v732_v63  ;;  %v728_v17 = vsel %vm727_vm0, %v711_v14, 0.0 }
 0x114   : > { %729 = vadd.xlane.f32.xlu1 %v728_v17 }
 0x17f   : > { %v734_v12 = vpop.xlane.xlu1 %733 }
 0x180   : > { %v735_v57 = vsel %vm611_vm6, %v734_v12, 0.0 }
 0x187   : > { %v730_v27 = vpop.xlane.xlu1 %729 }
 0x188   : > { %v736_v47 = vadd.f32 %v735_v57, %v730_v27 }
 0x18a   : > { %v737_v56 = vrot.slane %v736_v47, 4 }
 0x18c   : > { %v738_v35 = vadd.f32 %v737_v56, %v736_v47 }
 0x18e   : > { %v739_v18 = vrot.slane %v738_v35, 2 }
 0x190   : > { %v740_v16 = vadd.f32 %v739_v18, %v738_v35 }
 0x192   : > { %v741_v31 = vrot.slane %v740_v16, 1 }
 0x194   : > { %v742_v37 = vadd.f32 %v741_v31, %v740_v16 }
 0x196   : > { %744 = vst.msk [vmem:[%s328_s6] sm:$0x1] %vm743_vm1, %v742_v37 }
 0x197 PF: > { %p18_p1 = scmp.ge.s32.totalorder %s1164_s30, 4   ;;  %s1496_s18 = smov %s1077_s19 }
 0x198   : > { %s1497_s19 = smov %s1081_s20  ;;  %s1498_s20 = smov %s1177_s10 }
 0x199   : > { %s1499_s21 = smov %s1164_s30  ;;  %20 = sbr.rel (!%p18_p1) target bundleno = 7 (0x7), region = 103 }
 0x19e   :  { %762 = vsyncpa [#allocation3], 1 }
 0x19f   :  { %764 = vsyncpa [#allocation3 + $0x1], 1 }
 0x1a0   :  { %765 = vsyncpa [#allocation5], 1 }
 0x1a1   :  { %767 = vsyncpa [#allocation5 + $0x1], 1 }

</bundles_post_ra>
